<compile_context>
chip_gen: v5e
topology: v5e:2x2
jax: 0.10.0
libtpu: 0.0.40
codegen_flags: <defaults>
</compile_context>

<pallas_src>
import functools

import jax
import jax.numpy as jnp
from jax.experimental import pallas as pl
from jax.experimental.pallas import tpu as pltpu


_VMEM_BUDGET = 24 * 1024 * 1024   # conservative: fits v7x's 32 MiB scoped default
_VMEM_LIMIT = 48 * 1024 * 1024    # explicit scoped limit (< v7x 64 MiB physical)
_BN_EPS = 1e-5


# ----------------------------------------------------------------------------
# Pallas kernels
# ----------------------------------------------------------------------------
def _matmul_bn_relu_kernel(w_ref, p_ref, g_ref, b_ref, o_ref, mean_ref, m2_ref,
                           *, tm, nblk, nphase, mp, eps):
    """Fused y = W_phase @ patches_phase (MXU, bf16 in / f32 acc) with
    streaming train-mode BatchNorm statistics.

    Grid = (phase, m-tile). The (C_out, P*M) bf16 output stays resident in
    VMEM across the whole grid; per-tile mean / mean-subtracted M2 are
    Chan-combined into f32 scratch each step, and the last step applies
    scale/shift + ReLU to the resident slab in a single pass."""
    p = pl.program_id(0)
    i = pl.program_id(1)
    t = p * nblk + i                       # linear step index
    nsteps = nphase * nblk

    y = jnp.dot(w_ref[0], p_ref[0], preferred_element_type=jnp.float32)

    col = pl.multiple_of(p * mp + i * tm, 128)
    o_ref[:, pl.ds(col, tm)] = y.astype(o_ref.dtype)

    # Per-tile stats (mean-subtracted; avoids E[y^2]-E[y]^2 cancellation).
    tile_mean = jnp.sum(y, axis=1, keepdims=True) * (1.0 / tm)
    d = y - tile_mean
    tile_m2 = jnp.sum(d * d, axis=1, keepdims=True)

    @pl.when(t == 0)
    def _():
        mean_ref[...] = jnp.zeros_like(mean_ref)
        m2_ref[...] = jnp.zeros_like(m2_ref)

    # Chan parallel-variance combine of (running, tile).
    n_old = (t * tm).astype(jnp.float32)
    n_new = n_old + float(tm)
    delta = tile_mean - mean_ref[...]
    mean_ref[...] = mean_ref[...] + delta * (tm / n_new)
    m2_ref[...] = m2_ref[...] + tile_m2 + delta * delta * (n_old * tm / n_new)

    @pl.when(t == nsteps - 1)
    def _():
        mean = mean_ref[...]
        var = m2_ref[...] * (1.0 / (nsteps * tm))     # biased (PyTorch train BN)
        scale = g_ref[...] * jax.lax.rsqrt(var + eps)
        shift = b_ref[...] - mean * scale
        yf = o_ref[...].astype(jnp.float32)           # resident (C_out, P*M)
        o_ref[...] = jnp.maximum(yf * scale + shift, 0.0).astype(o_ref.dtype)


def _matmul_tanh_kernel(w_ref, p_ref, o_ref):
    """Final layer: y = W_phase @ patches_phase, tanh epilogue, fully tiled."""
    y = jnp.dot(w_ref[0], p_ref[0], preferred_element_type=jnp.float32)
    o_ref[...] = jnp.tanh(y)


# ----------------------------------------------------------------------------
# VMEM-budget-aware tile selection (lane tiles are always multiples of 128)
# ----------------------------------------------------------------------------
def _pick_tile_bn(mp, nphase, kd, c_out):
    """Tile for the fused BN kernel (resident bf16 output). None -> fallback."""
    resident = nphase * mp * c_out * 2                 # bf16 resident output
    fixed = 2 * c_out * kd * 2 + 4 * c_out * 4 + 2 * c_out * 4
    avail = _VMEM_BUDGET - resident - fixed
    per_col = 2 * kd * 2                               # double-buffered bf16 patches
    if avail < per_col * 128:
        return None
    cap = min(avail // per_col, mp, 2048)
    cap = (cap // 128) * 128
    if cap < 128:
        return None
    for t in range(cap, 127, -128):
        if mp % t == 0:
            return t
    return None


def _pick_tile_mm(mp, kd, c_out, out_bytes):
    """Tile for the plain matmul(+tanh) kernel (tiled output)."""
    fixed = 2 * c_out * kd * 2
    per_col = 2 * (kd * 2 + c_out * out_bytes)
    avail = _VMEM_BUDGET - fixed
    if avail < per_col * 128:
        return None
    cap = min(avail // per_col, mp, 2048)
    cap = (cap // 128) * 128
    if cap < 128:
        return None
    for t in range(cap, 127, -128):
        if mp % t == 0:
            return t
    return None


# ----------------------------------------------------------------------------
# Pallas wrappers
# ----------------------------------------------------------------------------
def _conv_bn_relu_pallas(wp, patches, gamma, beta, tm, eps=_BN_EPS):
    nphase, c_out, kd = wp.shape
    mp = patches.shape[-1]
    nblk = mp // tm
    mtot = nphase * mp
    kernel = functools.partial(_matmul_bn_relu_kernel, tm=tm, nblk=nblk,
                               nphase=nphase, mp=mp, eps=eps)
    flops = 2 * c_out * kd * mp * nphase + 8 * c_out * mtot
    bytes_accessed = (nphase * kd * mp * 2 + nphase * c_out * kd * 2
                      + c_out * mtot * 2 + 2 * c_out * 4)
    return pl.pallas_call(
        kernel,
        out_shape=jax.ShapeDtypeStruct((c_out, mtot), jnp.bfloat16),
        grid_spec=pltpu.PrefetchScalarGridSpec(
            num_scalar_prefetch=0,
            grid=(nphase, nblk),
            in_specs=[
                pl.BlockSpec((1, c_out, kd), lambda p, i: (p, 0, 0)),  # weights
                pl.BlockSpec((1, kd, tm), lambda p, i: (p, 0, i)),     # patches
                pl.BlockSpec((c_out, 1), lambda p, i: (0, 0)),         # gamma
                pl.BlockSpec((c_out, 1), lambda p, i: (0, 0)),         # beta
            ],
            # Output block = full (C_out, P*M): resident in VMEM across the
            # whole grid (BN needs global batch stats before the epilogue).
            out_specs=pl.BlockSpec((c_out, mtot), lambda p, i: (0, 0)),
            scratch_shapes=[pltpu.VMEM((c_out, 1), jnp.float32),   # running mean
                            pltpu.VMEM((c_out, 1), jnp.float32)],  # running M2
        ),
        compiler_params=pltpu.CompilerParams(
            dimension_semantics=("arbitrary", "arbitrary"),
            vmem_limit_bytes=_VMEM_LIMIT),
        cost_estimate=pl.CostEstimate(flops=int(flops),
                                      transcendentals=int(c_out),
                                      bytes_accessed=int(bytes_accessed)),
    )(wp, patches, gamma, beta)


def _conv_tanh_pallas(wp, patches, tm):
    nphase, c_out, kd = wp.shape
    mp = patches.shape[-1]
    nblk = mp // tm
    mtot = nphase * mp
    flops = 2 * c_out * kd * mp * nphase
    bytes_accessed = (nphase * kd * mp * 2 + nphase * c_out * kd * 2
                      + c_out * mtot * 4)
    return pl.pallas_call(
        _matmul_tanh_kernel,
        out_shape=jax.ShapeDtypeStruct((c_out, mtot), jnp.float32),
        grid_spec=pltpu.PrefetchScalarGridSpec(
            num_scalar_prefetch=0,
            grid=(nphase, nblk),
            in_specs=[
                pl.BlockSpec((1, c_out, kd), lambda p, i: (p, 0, 0)),
                pl.BlockSpec((1, kd, tm), lambda p, i: (p, 0, i)),
            ],
            out_specs=pl.BlockSpec((c_out, tm),
                                   lambda p, i: (0, p * nblk + i)),
        ),
        # No cross-tile coupling -> fully parallel (megacore-friendly on v7x).
        compiler_params=pltpu.CompilerParams(
            dimension_semantics=("parallel", "parallel"),
            vmem_limit_bytes=_VMEM_LIMIT),
        cost_estimate=pl.CostEstimate(flops=int(flops),
                                      transcendentals=int(c_out * mtot),
                                      bytes_accessed=int(bytes_accessed)),
    )(wp, patches)


# ----------------------------------------------------------------------------
# Layer glue (pad / patch slicing / reshapes only — fuses under jit)
# ----------------------------------------------------------------------------
def _im2col(xp, k, ho, wo):
    """Stride-1 path. xp: (C, N, Hp, Wp) -> (C*k*k, N*ho*wo), lane dim = M."""
    c, n = xp.shape[0], xp.shape[1]
    cols = []
    for ki in range(k):
        for kj in range(k):
            cols.append(xp[:, :, ki:ki + ho, kj:kj + wo])
    return jnp.stack(cols, axis=1).reshape(c * k * k, n * ho * wo)


def _phase_patches(xp, h, w):
    """Stride-2 sub-pixel path. xp: (C, N, H+2, W+2) (pad=1 each side) ->
    patches (4, C*4, N*H*W); phase p = rh*2 + rw, row = ci*4 + dh*2 + dw."""
    c, n = xp.shape[0], xp.shape[1]
    phases = []
    for rh in (0, 1):
        for rw in (0, 1):
            taps = []
            for dh in (0, 1):
                for dw in (0, 1):
                    taps.append(xp[:, :, rh + dh:rh + dh + h,
                                   rw + dw:rw + dw + w])
            phases.append(jnp.stack(taps, axis=1).reshape(c * 4, n * h * w))
    return jnp.stack(phases, axis=0)


def _phase_weights(w):
    """w: (Cin, Cout, 4, 4) -> per-phase 2x2 matrices (4, Cout, Cin*4), bf16.
    Phase (rh, rw) pairs input tap dh with kernel row kh_map[rh][dh]."""
    ci, co = w.shape[0], w.shape[1]
    kmap = {0: [3, 1], 1: [2, 0]}
    mats = []
    for rh in (0, 1):
        for rw in (0, 1):
            sub = w[:, :, kmap[rh], :][:, :, :, kmap[rw]]      # (Ci, Co, 2, 2)
            mats.append(jnp.transpose(sub, (1, 0, 2, 3)).reshape(co, ci * 4))
    return jnp.stack(mats, axis=0).astype(jnp.bfloat16)


def _apply_conv(layer, patches, act):
    """Dispatch the (P, Kd, M) patch batch to Pallas or fused XLA.
    Returns (C_out, P, M): bf16 for BN+ReLU layers, f32 for the tanh layer."""
    wp = layer["w"]
    nphase, c_out, kd = wp.shape
    mp = patches.shape[-1]
    lane_ok = (mp >= 256) and (mp % 128 == 0)

    if act == "relu":
        tm = _pick_tile_bn(mp, nphase, kd, c_out) if lane_ok else None
        if tm is not None:
            y = _conv_bn_relu_pallas(wp, patches, layer["gamma"], layer["beta"],
                                     tm)
            return y.reshape(c_out, nphase, mp)
        # Fused XLA fallback (small layers / resident slab over VMEM budget).
        y = jnp.einsum("pck,pkm->cpm", wp, patches,
                       preferred_element_type=jnp.float32)
        mean = jnp.mean(y, axis=(1, 2), keepdims=True)
        var = jnp.mean((y - mean) ** 2, axis=(1, 2), keepdims=True)
        g = layer["gamma"].reshape(c_out, 1, 1)
        b = layer["beta"].reshape(c_out, 1, 1)
        yn = (y - mean) * (g * jax.lax.rsqrt(var + _BN_EPS)) + b
        return jnp.maximum(yn, 0.0).astype(jnp.bfloat16)

    # tanh (final layer)
    tm = _pick_tile_mm(mp, kd, c_out, 4) if lane_ok else None
    if tm is not None:
        y = _conv_tanh_pallas(wp, patches, tm)
        return y.reshape(c_out, nphase, mp)
    y = jnp.einsum("pck,pkm->cpm", wp, patches,
                   preferred_element_type=jnp.float32)
    return jnp.tanh(y)


def _reassemble(y, n, ho, wo, stride):
    """(C_out, P, M_phase) -> (C_out, N, H_out, W_out), interleaving phases."""
    c_out = y.shape[0]
    if stride == 1:
        return y.reshape(c_out, n, ho, wo)
    hi, wi = ho // 2, wo // 2
    y = y.reshape(c_out, 2, 2, n, hi, wi)            # (c, rh, rw, n, a, b)
    y = jnp.transpose(y, (0, 3, 4, 1, 5, 2))         # (c, n, a, rh, b, rw)
    return y.reshape(c_out, n, ho, wo)


def _conv_transpose_layer(h, layer, cfg):
    """ConvTranspose2d(bias=False) [+ BatchNorm2d train-mode + ReLU | + Tanh].
    `h` is (C, N, H, W), bf16 (lane-dense M inside the kernels)."""
    stride, padding, k, act = cfg
    c_in, n, hh, ww = h.shape
    if stride == 1:
        pad = k - 1 - padding
        ho, wo = hh + 2 * pad - k + 1, ww + 2 * pad - k + 1
        xp = jnp.pad(h, ((0, 0), (0, 0), (pad, pad), (pad, pad)))
        patches = _im2col(xp, k, ho, wo)[None]            # (1, Cin*k*k, M)
    else:
        # 4-phase sub-pixel decomposition (requires K=4, stride=2, padding=1).
        assert stride == 2 and padding == 1 and k == 4
        ho, wo = 2 * hh, 2 * ww
        xp = jnp.pad(h, ((0, 0), (0, 0), (1, 1), (1, 1)))
        patches = _phase_patches(xp, hh, ww)              # (4, Cin*4, N*H*W)
    patches = patches.astype(jnp.bfloat16)
    y = _apply_conv(layer, patches, act)                  # (Cout, P, M)
    return _reassemble(y, n, ho, wo, stride)


# ----------------------------------------------------------------------------
# Generator: init (matches weights_init) + forward
# ----------------------------------------------------------------------------
def init_generator(key, latent_dim, gdim, image_num_channels):
    # (Cin, Cout, stride, padding) for the 5 ConvTranspose2d layers, K=4.
    specs = [
        (latent_dim, gdim * 8, 1, 0),
        (gdim * 8, gdim * 4, 2, 1),
        (gdim * 4, gdim * 2, 2, 1),
        (gdim * 2, gdim, 2, 1),
        (gdim, image_num_channels, 2, 1),
    ]
    k = 4
    params, configs = [], []
    nlayers = len(specs)
    for idx, (cin, cout, s, p) in enumerate(specs):
        key, kw, kg = jax.random.split(key, 3)
        w = 0.02 * jax.random.normal(kw, (cin, cout, k, k), jnp.float32)
        if s == 1:
            # Hoisted weight prep: spatial flip + (Cin,Cout) swap + flatten.
            wmat = jnp.transpose(w[:, :, ::-1, ::-1], (1, 0, 2, 3)).reshape(
                cout, cin * k * k)[None].astype(jnp.bfloat16)   # (1, Co, Kd)
        else:
            wmat = _phase_weights(w)                            # (4, Co, Ci*4)
        if idx < nlayers - 1:  # BatchNorm + ReLU after all but the last conv
            gamma = (1.0 + 0.02 * jax.random.normal(kg, (cout,), jnp.float32)
                     ).reshape(cout, 1)
            beta = jnp.zeros((cout, 1), jnp.float32)
            act = "relu"
        else:
            gamma = beta = None
            act = "tanh"
        params.append(dict(w=wmat, gamma=gamma, beta=beta))
        configs.append((s, p, k, act))
    return params, tuple(configs)


def generator_forward(params, x, *, configs):
    # NCHW -> (C, N, H, W): flattened N*H*W axis lands on lanes in the kernels.
    h = jnp.transpose(x, (1, 0, 2, 3)).astype(jnp.bfloat16)
    for layer, cfg in zip(params, configs):
        h = _conv_transpose_layer(h, layer, cfg)
    return jnp.transpose(h, (1, 0, 2, 3)).astype(jnp.float32)  # NCHW, f32


# ----------------------------------------------------------------------------
# Demo
# ----------------------------------------------------------------------------
if __name__ == "__main__":
    latent_dim = 16
    G_feature_map_dim = 8
    image_num_channels = 3
    batch = 2

    key = jax.random.PRNGKey(0)
    kp, kx = jax.random.split(key)
    params, configs = init_generator(kp, latent_dim, G_feature_map_dim,
                                     image_num_channels)

    # DCGAN generator input: latent vector as (N, latent_dim, 1, 1) NCHW.
    x = jax.random.normal(kx, (batch, latent_dim, 1, 1), jnp.float32)

    fwd = jax.jit(functools.partial(generator_forward, configs=configs))
    out = jax.block_until_ready(fwd(params, x))

    expected = (batch, image_num_channels, 64, 64)
    assert out.shape == expected, (out.shape, expected)
    assert out.dtype == jnp.float32
    assert bool(jnp.all(jnp.isfinite(out)))
    assert bool(jnp.all(jnp.abs(out) <= 1.0 + 1e-6))  # tanh output range

    print("KERNEL_OK")
</pallas_src>

<mosaic_0001>
module attributes {stable_mosaic.version = 11 : i64} {
  func.func @_matmul_bn_relu_kernel(%arg0: i32, %arg1: i32, %arg2: memref<1x8x64xbf16, #tpu.memory_space<vmem>>, %arg3: memref<1x64x512xbf16, #tpu.memory_space<vmem>>, %arg4: memref<8x1xf32, #tpu.memory_space<vmem>>, %arg5: memref<8x1xf32, #tpu.memory_space<vmem>>, %arg6: memref<8x2048xbf16, #tpu.memory_space<vmem>>, %arg7: memref<8x1xf32, #tpu.memory_space<vmem>>, %arg8: memref<8x1xf32, #tpu.memory_space<vmem>>) attributes {dimension_semantics = [#tpu.dimension_semantics<arbitrary>, #tpu.dimension_semantics<arbitrary>], iteration_bounds = array<i64: 4, 1>, scalar_prefetch = 0 : i64, scratch_operands = 2 : i64, tpu.core_type = #tpu.core_type<tc>, window_params = [{transform_indices = @transform_0, window_bounds = array<i64: 1, 8, 64>}, {transform_indices = @transform_1, window_bounds = array<i64: 1, 64, 512>}, {pipeline_mode = #tpu.pipeline_mode<synchronous>, transform_indices = @transform_2, window_bounds = array<i64: 8, 1>}, {pipeline_mode = #tpu.pipeline_mode<synchronous>, transform_indices = @transform_3, window_bounds = array<i64: 8, 1>}, {pipeline_mode = #tpu.pipeline_mode<synchronous>, transform_indices = @transform_4, window_bounds = array<i64: 8, 2048>}]} {
    %c1_i32 = arith.constant 1 : i32
    %0 = arith.muli %arg0, %c1_i32 : i32
    %1 = arith.addi %0, %arg1 : i32
    %c0 = arith.constant 0 : index
    %c0_0 = arith.constant 0 : index
    %c0_1 = arith.constant 0 : index
    %2 = vector.load %arg2[%c0, %c0_0, %c0_1] : memref<1x8x64xbf16, #tpu.memory_space<vmem>>, vector<1x8x64xbf16>
    %3 = vector.shape_cast %2 : vector<1x8x64xbf16> to vector<8x64xbf16>
    %c0_2 = arith.constant 0 : index
    %c0_3 = arith.constant 0 : index
    %c0_4 = arith.constant 0 : index
    %4 = vector.load %arg3[%c0_2, %c0_3, %c0_4] : memref<1x64x512xbf16, #tpu.memory_space<vmem>>, vector<1x64x512xbf16>
    %5 = vector.shape_cast %4 : vector<1x64x512xbf16> to vector<64x512xbf16>
    %cst = arith.constant dense<0.000000e+00> : vector<8x512xf32>
    %6 = tpu.matmul %3, %5, %cst {dimension_numbers = #tpu.dot_dimension_numbers<[1], [0], [0], [1], [0, 0, 1, 1], [], []>} : vector<8x64xbf16>, vector<64x512xbf16>, vector<8x512xf32> -> vector<8x512xf32>
    %c512_i32 = arith.constant 512 : i32
    %7 = arith.muli %arg0, %c512_i32 : i32
    %c512_i32_5 = arith.constant 512 : i32
    %8 = arith.muli %arg1, %c512_i32_5 : i32
    %9 = arith.addi %7, %8 : i32
    %10 = tpu.assume_multiple %9, 128 : i32
    %11 = arith.truncf %6 : vector<8x512xf32> to vector<8x512xbf16>
    %c0_6 = arith.constant 0 : index
    %12 = arith.index_cast %10 : i32 to index
    %13 = vector.load %arg6[%c0_6, %12] : memref<8x2048xbf16, #tpu.memory_space<vmem>>, vector<8x512xbf16>
    tpu.vector_store %arg6[%c0_6, %12], %11 {strides = array<i32>} : memref<8x2048xbf16, #tpu.memory_space<vmem>>, vector<8x512xbf16>,
    %cst_7 = arith.constant dense<0.000000e+00> : vector<8xf32>
    %14 = vector.multi_reduction <add>, %6, %cst_7 [1] : vector<8x512xf32> to vector<8xf32>
    %15 = vector.shape_cast %14 : vector<8xf32> to vector<8x1xf32>
    %cst_8 = arith.constant 0.001953125 : f32
    %16 = vector.broadcast %cst_8 : f32 to vector<8x1xf32>
    %17 = arith.mulf %15, %16 : vector<8x1xf32>
    %18 = vector.broadcast %17 : vector<8x1xf32> to vector<8x512xf32>
    %19 = arith.subf %6, %18 : vector<8x512xf32>
    %20 = arith.mulf %19, %19 : vector<8x512xf32>
    %cst_9 = arith.constant dense<0.000000e+00> : vector<8xf32>
    %21 = vector.multi_reduction <add>, %20, %cst_9 [1] : vector<8x512xf32> to vector<8xf32>
    %22 = vector.shape_cast %21 : vector<8xf32> to vector<8x1xf32>
    %c0_i32 = arith.constant 0 : i32
    %23 = arith.cmpi eq, %1, %c0_i32 : i32
    %24 = arith.extui %23 : i1 to i32
    %c0_i32_10 = arith.constant 0 : i32
    %25 = arith.cmpi ne, %24, %c0_i32_10 : i32
    scf.if %25 {
      %cst_26 = arith.constant 0.000000e+00 : f32
      %49 = vector.broadcast %cst_26 : f32 to vector<8x1xf32>
      %c0_27 = arith.constant 0 : index
      %c0_28 = arith.constant 0 : index
      %50 = vector.load %arg7[%c0_27, %c0_28] : memref<8x1xf32, #tpu.memory_space<vmem>>, vector<8x1xf32>
      tpu.vector_store %arg7[%c0_27, %c0_28], %49 {strides = array<i32>} : memref<8x1xf32, #tpu.memory_space<vmem>>, vector<8x1xf32>,
      %cst_29 = arith.constant 0.000000e+00 : f32
      %51 = vector.broadcast %cst_29 : f32 to vector<8x1xf32>
      %c0_30 = arith.constant 0 : index
      %c0_31 = arith.constant 0 : index
      %52 = vector.load %arg8[%c0_30, %c0_31] : memref<8x1xf32, #tpu.memory_space<vmem>>, vector<8x1xf32>
      tpu.vector_store %arg8[%c0_30, %c0_31], %51 {strides = array<i32>} : memref<8x1xf32, #tpu.memory_space<vmem>>, vector<8x1xf32>,
    } else {
    }
    %c512_i32_11 = arith.constant 512 : i32
    %26 = arith.muli %1, %c512_i32_11 : i32
    %27 = arith.sitofp %26 : i32 to f32
    %cst_12 = arith.constant 5.120000e+02 : f32
    %28 = arith.addf %27, %cst_12 : f32
    %c0_13 = arith.constant 0 : index
    %c0_14 = arith.constant 0 : index
    %29 = vector.load %arg7[%c0_13, %c0_14] : memref<8x1xf32, #tpu.memory_space<vmem>>, vector<8x1xf32>
    %30 = arith.subf %17, %29 : vector<8x1xf32>
    %c0_15 = arith.constant 0 : index
    %c0_16 = arith.constant 0 : index
    %31 = vector.load %arg7[%c0_15, %c0_16] : memref<8x1xf32, #tpu.memory_space<vmem>>, vector<8x1xf32>
    %cst_17 = arith.constant 5.120000e+02 : f32
    %32 = arith.divf %cst_17, %28 : f32
    %33 = vector.broadcast %32 : f32 to vector<8x1xf32>
    %34 = arith.mulf %30, %33 : vector<8x1xf32>
    %35 = arith.addf %31, %34 : vector<8x1xf32>
    %c0_18 = arith.constant 0 : index
    %c0_19 = arith.constant 0 : index
    %36 = vector.load %arg7[%c0_18, %c0_19] : memref<8x1xf32, #tpu.memory_space<vmem>>, vector<8x1xf32>
    tpu.vector_store %arg7[%c0_18, %c0_19], %35 {strides = array<i32>} : memref<8x1xf32, #tpu.memory_space<vmem>>, vector<8x1xf32>,
    %c0_20 = arith.constant 0 : index
    %c0_21 = arith.constant 0 : index
    %37 = vector.load %arg8[%c0_20, %c0_21] : memref<8x1xf32, #tpu.memory_space<vmem>>, vector<8x1xf32>
    %38 = arith.addf %37, %22 : vector<8x1xf32>
    %39 = arith.mulf %30, %30 : vector<8x1xf32>
    %cst_22 = arith.constant 5.120000e+02 : f32
    %40 = arith.mulf %27, %cst_22 : f32
    %41 = arith.divf %40, %28 : f32
    %42 = vector.broadcast %41 : f32 to vector<8x1xf32>
    %43 = arith.mulf %39, %42 : vector<8x1xf32>
    %44 = arith.addf %38, %43 : vector<8x1xf32>
    %c0_23 = arith.constant 0 : index
    %c0_24 = arith.constant 0 : index
    %45 = vector.load %arg8[%c0_23, %c0_24] : memref<8x1xf32, #tpu.memory_space<vmem>>, vector<8x1xf32>
    tpu.vector_store %arg8[%c0_23, %c0_24], %44 {strides = array<i32>} : memref<8x1xf32, #tpu.memory_space<vmem>>, vector<8x1xf32>,
    %c3_i32 = arith.constant 3 : i32
    %46 = arith.cmpi eq, %1, %c3_i32 : i32
    %47 = arith.extui %46 : i1 to i32
    %c0_i32_25 = arith.constant 0 : i32
    %48 = arith.cmpi ne, %47, %c0_i32_25 : i32
    scf.if %48 {
      %c0_26 = arith.constant 0 : index
      %c0_27 = arith.constant 0 : index
      %49 = vector.load %arg7[%c0_26, %c0_27] : memref<8x1xf32, #tpu.memory_space<vmem>>, vector<8x1xf32>
      %c0_28 = arith.constant 0 : index
      %c0_29 = arith.constant 0 : index
      %50 = vector.load %arg8[%c0_28, %c0_29] : memref<8x1xf32, #tpu.memory_space<vmem>>, vector<8x1xf32>
      %cst_30 = arith.constant 4.8828125E-4 : f32
      %51 = vector.broadcast %cst_30 : f32 to vector<8x1xf32>
      %52 = arith.mulf %50, %51 : vector<8x1xf32>
      %c0_31 = arith.constant 0 : index
      %c0_32 = arith.constant 0 : index
      %53 = vector.load %arg4[%c0_31, %c0_32] : memref<8x1xf32, #tpu.memory_space<vmem>>, vector<8x1xf32>
      %cst_33 = arith.constant 9.99999974E-6 : f32
      %54 = vector.broadcast %cst_33 : f32 to vector<8x1xf32>
      %55 = arith.addf %52, %54 : vector<8x1xf32>
      %56 = math.rsqrt %55 : vector<8x1xf32>
      %57 = arith.mulf %53, %56 : vector<8x1xf32>
      %c0_34 = arith.constant 0 : index
      %c0_35 = arith.constant 0 : index
      %58 = vector.load %arg5[%c0_34, %c0_35] : memref<8x1xf32, #tpu.memory_space<vmem>>, vector<8x1xf32>
      %59 = arith.mulf %49, %57 : vector<8x1xf32>
      %60 = arith.subf %58, %59 : vector<8x1xf32>
      %c0_36 = arith.constant 0 : index
      %c0_37 = arith.constant 0 : index
      %61 = vector.load %arg6[%c0_36, %c0_37] : memref<8x2048xbf16, #tpu.memory_space<vmem>>, vector<8x2048xbf16>
      %62 = arith.extf %61 : vector<8x2048xbf16> to vector<8x2048xf32>
      %63 = vector.broadcast %57 : vector<8x1xf32> to vector<8x2048xf32>
      %64 = arith.mulf %62, %63 : vector<8x2048xf32>
      %65 = vector.broadcast %60 : vector<8x1xf32> to vector<8x2048xf32>
      %66 = arith.addf %64, %65 : vector<8x2048xf32>
      %cst_38 = arith.constant 0.000000e+00 : f32
      %67 = vector.broadcast %cst_38 : f32 to vector<8x2048xf32>
      %68 = arith.maximumf %66, %67 : vector<8x2048xf32>
      %69 = arith.truncf %68 : vector<8x2048xf32> to vector<8x2048xbf16>
      %c0_39 = arith.constant 0 : index
      %c0_40 = arith.constant 0 : index
      %70 = vector.load %arg6[%c0_39, %c0_40] : memref<8x2048xbf16, #tpu.memory_space<vmem>>, vector<8x2048xbf16>
      tpu.vector_store %arg6[%c0_39, %c0_40], %69 {strides = array<i32>} : memref<8x2048xbf16, #tpu.memory_space<vmem>>, vector<8x2048xbf16>,
    } else {
    }
    return
  }
  func.func @transform_0(%arg0: i32, %arg1: i32) -> (i32, i32, i32) {
    %c0_i32 = arith.constant 0 : i32
    %c0_i32_0 = arith.constant 0 : i32
    %c0_i32_1 = arith.constant 0 : i32
    return %arg0, %c0_i32, %c0_i32_0 : i32, i32, i32
  }
  func.func @transform_1(%arg0: i32, %arg1: i32) -> (i32, i32, i32) {
    %c0_i32 = arith.constant 0 : i32
    %c0_i32_0 = arith.constant 0 : i32
    return %arg0, %c0_i32, %arg1 : i32, i32, i32
  }
  func.func @transform_2(%arg0: i32, %arg1: i32) -> (i32, i32) {
    %c0_i32 = arith.constant 0 : i32
    %c0_i32_0 = arith.constant 0 : i32
    %c0_i32_1 = arith.constant 0 : i32
    return %c0_i32, %c0_i32_0 : i32, i32
  }
  func.func @transform_3(%arg0: i32, %arg1: i32) -> (i32, i32) {
    %c0_i32 = arith.constant 0 : i32
    %c0_i32_0 = arith.constant 0 : i32
    %c0_i32_1 = arith.constant 0 : i32
    return %c0_i32, %c0_i32_0 : i32, i32
  }
  func.func @transform_4(%arg0: i32, %arg1: i32) -> (i32, i32) {
    %c0_i32 = arith.constant 0 : i32
    %c0_i32_0 = arith.constant 0 : i32
    %c0_i32_1 = arith.constant 0 : i32
    return %c0_i32, %c0_i32_0 : i32, i32
  }
}

module attributes {stable_mosaic.version = 11 : i64} {
  func.func @_matmul_tanh_kernel(%arg0: i32, %arg1: i32, %arg2: memref<1x3x32xbf16, #tpu.memory_space<vmem>>, %arg3: memref<1x32x2048xbf16, #tpu.memory_space<vmem>>, %arg4: memref<3x2048xf32, #tpu.memory_space<vmem>>) attributes {dimension_semantics = [#tpu.dimension_semantics<parallel>, #tpu.dimension_semantics<parallel>], iteration_bounds = array<i64: 4, 1>, scalar_prefetch = 0 : i64, scratch_operands = 0 : i64, tpu.core_type = #tpu.core_type<tc>, window_params = [{transform_indices = @transform_0, window_bounds = array<i64: 1, 3, 32>}, {transform_indices = @transform_1, window_bounds = array<i64: 1, 32, 2048>}, {transform_indices = @transform_2, window_bounds = array<i64: 3, 2048>}]} {
    %c0 = arith.constant 0 : index
    %c0_0 = arith.constant 0 : index
    %c0_1 = arith.constant 0 : index
    %0 = vector.load %arg2[%c0, %c0_0, %c0_1] : memref<1x3x32xbf16, #tpu.memory_space<vmem>>, vector<1x3x32xbf16>
    %1 = vector.shape_cast %0 : vector<1x3x32xbf16> to vector<3x32xbf16>
    %c0_2 = arith.constant 0 : index
    %c0_3 = arith.constant 0 : index
    %c0_4 = arith.constant 0 : index
    %2 = vector.load %arg3[%c0_2, %c0_3, %c0_4] : memref<1x32x2048xbf16, #tpu.memory_space<vmem>>, vector<1x32x2048xbf16>
    %3 = vector.shape_cast %2 : vector<1x32x2048xbf16> to vector<32x2048xbf16>
    %cst = arith.constant dense<0.000000e+00> : vector<3x2048xf32>
    %4 = tpu.matmul %1, %3, %cst {dimension_numbers = #tpu.dot_dimension_numbers<[1], [0], [0], [1], [0, 0, 1, 1], [], []>} : vector<3x32xbf16>, vector<32x2048xbf16>, vector<3x2048xf32> -> vector<3x2048xf32>
    %5 = math.tanh %4 : vector<3x2048xf32>
    %c0_5 = arith.constant 0 : index
    %c0_6 = arith.constant 0 : index
    %6 = vector.load %arg4[%c0_5, %c0_6] : memref<3x2048xf32, #tpu.memory_space<vmem>>, vector<3x2048xf32>
    tpu.vector_store %arg4[%c0_5, %c0_6], %5 {strides = array<i32>} : memref<3x2048xf32, #tpu.memory_space<vmem>>, vector<3x2048xf32>,
    return
  }
  func.func @transform_0(%arg0: i32, %arg1: i32) -> (i32, i32, i32) {
    %c0_i32 = arith.constant 0 : i32
    %c0_i32_0 = arith.constant 0 : i32
    %c0_i32_1 = arith.constant 0 : i32
    return %arg0, %c0_i32, %c0_i32_0 : i32, i32, i32
  }
  func.func @transform_1(%arg0: i32, %arg1: i32) -> (i32, i32, i32) {
    %c0_i32 = arith.constant 0 : i32
    %c0_i32_0 = arith.constant 0 : i32
    return %arg0, %c0_i32, %arg1 : i32, i32, i32
  }
  func.func @transform_2(%arg0: i32, %arg1: i32) -> (i32, i32) {
    %c1_i32 = arith.constant 1 : i32
    %0 = arith.muli %arg0, %c1_i32 : i32
    %1 = arith.addi %0, %arg1 : i32
    %c0_i32 = arith.constant 0 : i32
    %c0_i32_0 = arith.constant 0 : i32
    return %c0_i32, %1 : i32, i32
  }
}

</mosaic_0001>

<bundles_post_ra>
// kernel: generator_forward.2
= control target key start
LH: loop header
LB: loop body
LE: loop exit
PB: predicated region body
PF: predicated region fallthrough
CT: control target
= control target key end

     0   :  { %s832_s15 = smov 0   ;;  %s834_s16 = smov 0   ;;  %s973_s0 = inlined_call_operand.vmem [shape: bf16[4,8,64], index: 0, kind: input, shape index: {}]   ;;  %s974_s1 = inlined_call_operand.vmem [shape: bf16[4,64,512], index: 1, kind: input, shape index: {}]   ;;  %s975_s2 = inlined_call_operand.vmem [shape: f32[8,1], index: 2, kind: input, shape index: {}]   ;;  %s976_s3 = inlined_call_operand.vmem [shape: f32[8,1], index: 3, kind: input, shape index: {}]   ;;  %s977_s4 = inlined_call_operand.vmem [shape: bf16[8,2048], index: 4, kind: output, shape index: {}]  }
   0x1   :  { %s836_s17 = smov 0  }
   0x2 LB: > { %s26_s18 = sadd.s32 1, %s799_s16  ;;  %p652_p0 = scmp.ge.s32.totalorder %s803_s17, 1  ;;  %s803_s17 = sphi %s836_s17, %s14_s17   ;;  %s799_s16 = sphi %s834_s16, %s979_s16   ;;  %s795_s15 = sphi %s832_s15, %s978_s15  }
   0x3   : > { %p28_p1 = scmp.ge.s32.totalorder %s26_s18, 4  ;;  %p185_p2 = scmp.lt.s32.totalorder %s803_s17, 5 }
   0x5   : > { %s981_s18 = smov (%p28_p1, %s26_s18), 0  ;;  %p186_p3 = pnand %p652_p0, %p185_p2 }
   0x6   : > { %p214_p4 = scmp.lt.s32.totalorder (!%p186_p3), %s795_s15, 3  ;;  %s724_s28 = sshll.u32 (!%p186_p3), %s795_s15, 9 }
   0x7   : > { %189 = sbr.rel (%p186_p3) target bundleno = 670 (0x29e), region = 36  ;;  %s388_s29 = sshra.s32 (!%p186_p3), %s724_s28, 7 }
   0x8   : > { %s725_s30 = sshll.u32 (!%p186_p3), %s388_s29, 2  ;;  %p726_p5 = scmp.ne.s32.totalorder (!%p186_p3), %s795_s15, 0 }
   0x9   : > { %s391_s7 = scalar_lea.vmem (!%p186_p3), %s977_s4, %s725_s30 }
   0xc   : > { %s854_s19 = scalar_select %p214_p4, %s795_s15, 3  ;;  %vm327_vm0 = vcmask 523264  }
   0xe   : > { %s731_s20 = sshll.u32 %s854_s19, 7  ;;  %s653_s24 = sshll.u32 %s854_s19, 2 }
   0xf   : > { %s860_s23 = scalar_lea.vmem %s974_s1, %s731_s20  ;;  %s217_s27 = scalar_lea.vmem %s973_s0, %s653_s24 }
  0x10   : > { %v706_v0 = vld [vmem:[%s860_s23 + $0x60] sm:$0xf]  ;;  %v746_v1 = vld [vmem:[%s860_s23 + $0x6c] sm:$0xf0]  ;;  %v744_v2 = vld [vmem:[%s860_s23 + $0x64] sm:$0xf] }
  0x11   : > { %v707_v3 = vor.u32 %v746_v1, %v706_v0  ;;  %v708_v4 = vld [vmem:[%s860_s23 + $0x70] sm:$0xf0]  ;;  %v714_v5 = vld [vmem:[%s860_s23 + $0x68] sm:$0xf]  ;;  %v747_v6 = vld [vmem:[%s860_s23 + $0x74] sm:$0xf0] }
  0x12   : > { %v711_v7 = vor.u32 %v744_v2, %v708_v4  ;;  %v715_v8 = vor.u32 %v747_v6, %v714_v5  ;;  %v745_v9 = vld [vmem:[%s860_s23 + $0x6c] sm:$0xf]  ;;  %v716_v10 = vld [vmem:[%s860_s23 + $0x78] sm:$0xf0]  ;;  %v690_v11 = vld [vmem:[%s860_s23 + $0x40] sm:$0xf] }
  0x13   : > { %335 = vmatpush.bf16.msra.mxu0 %v707_v3  ;;  %v719_v12 = vor.u32 %v745_v9, %v716_v10  ;;  %v742_v13 = vld [vmem:[%s860_s23 + $0x4c] sm:$0xf0]  ;;  %v740_v14 = vld [vmem:[%s860_s23 + $0x44] sm:$0xf]  ;;  %v692_v15 = vld [vmem:[%s860_s23 + $0x50] sm:$0xf0] }
  0x14   : > { %348 = vmatpush.bf16.msra.mxu1 %v711_v7  ;;  %361 = vmatpush.bf16.msra.mxu2 %v715_v8  ;;  %v691_v16 = vor.u32 %v742_v13, %v690_v11  ;;  %v695_v17 = vor.u32 %v740_v14, %v692_v15  ;;  %v698_v18 = vld [vmem:[%s860_s23 + $0x48] sm:$0xf]  ;;  %v743_v19 = vld [vmem:[%s860_s23 + $0x54] sm:$0xf0]  ;;  %v741_v20 = vld [vmem:[%s860_s23 + $0x4c] sm:$0xf] }
  0x15   : > { %374 = vmatpush.bf16.msra.mxu3 %v719_v12  ;;  %v699_v21 = vor.u32 %v743_v19, %v698_v18  ;;  %v700_v22 = vld [vmem:[%s860_s23 + $0x58] sm:$0xf0]  ;;  %v674_v23 = vld [vmem:[%s860_s23 + $0x20] sm:$0xf]  ;;  %v738_v24 = vld [vmem:[%s860_s23 + $0x2c] sm:$0xf0] }
  0x16   : > { %v703_v25 = vor.u32 %v741_v20, %v700_v22  ;;  %v736_v26 = vld [vmem:[%s860_s23 + $0x24] sm:$0xf]  ;;  %v676_v27 = vld [vmem:[%s860_s23 + $0x30] sm:$0xf0]  ;;  %v682_v28 = vld [vmem:[%s860_s23 + $0x28] sm:$0xf]  ;;  %v675_v29 = vor.u32 %v738_v24, %v674_v23 }
  0x17   : > { %336 = vmatpush.bf16.msra.mxu0 %v691_v16  ;;  %v739_v30 = vld [vmem:[%s860_s23 + $0x34] sm:$0xf0]  ;;  %v737_v31 = vld [vmem:[%s860_s23 + $0x2c] sm:$0xf]  ;;  %v684_v32 = vld [vmem:[%s860_s23 + $0x38] sm:$0xf0]  ;;  %v679_v33 = vor.u32 %v736_v26, %v676_v27 }
  0x18   : > { %349 = vmatpush.bf16.msra.mxu1 %v695_v17  ;;  %362 = vmatpush.bf16.msra.mxu2 %v699_v21  ;;  %v683_v34 = vor.u32 %v739_v30, %v682_v28  ;;  %v658_v35 = vld [vmem:[%s860_s23] sm:$0xf]  ;;  %v734_v36 = vld [vmem:[%s860_s23 + $0xc] sm:$0xf0]  ;;  %v732_v37 = vld [vmem:[%s860_s23 + $0x4] sm:$0xf]  ;;  %v687_v38 = vor.u32 %v737_v31, %v684_v32 }
  0x19   : > { %375 = vmatpush.bf16.msra.mxu3 %v703_v25  ;;  %v660_v39 = vld [vmem:[%s860_s23 + $0x10] sm:$0xf0]  ;;  %v666_v40 = vld [vmem:[%s860_s23 + $0x8] sm:$0xf]  ;;  %v735_v41 = vld [vmem:[%s860_s23 + $0x14] sm:$0xf0]  ;;  %v659_v44 = vor.u32 %v734_v36, %v658_v35 }
  0x1a   : > { %v733_v42 = vld [vmem:[%s860_s23 + $0xc] sm:$0xf]  ;;  %v668_v43 = vld [vmem:[%s860_s23 + $0x18] sm:$0xf0]  ;;  %v663_v45 = vor.u32 %v732_v37, %v660_v39  ;;  %v667_v46 = vor.u32 %v735_v41, %v666_v40  ;;  %v230_v48 = vld [vmem:[%s217_s27] sm:$0xf] }
  0x1b   : > { %337 = vmatpush.bf16.msra.mxu0 %v675_v29  ;;  %v671_v47 = vor.u32 %v733_v42, %v668_v43 }
  0x1c   : > { %350 = vmatpush.bf16.msra.mxu1 %v679_v33  ;;  %363 = vmatpush.bf16.msra.mxu2 %v683_v34 }
  0x1d   : > { %376 = vmatpush.bf16.msra.mxu3 %v687_v38 }
  0x1f   : > { %338 = vmatpush.bf16.msra.mxu0 %v659_v44 }
  0x20   : > { %351 = vmatpush.bf16.msra.mxu1 %v663_v45  ;;  %364 = vmatpush.bf16.msra.mxu2 %v667_v46 }
  0x21   : > { %377 = vmatpush.bf16.msra.mxu3 %v671_v47 }
  0x22   : > { %720 = vmatmul.msk.bf16.vlgmr.msra.gmra.mxu0 %vm327_vm0, %v230_v48 }
  0x23   : > { %721 = vmatmul.msk.bf16.vlgmr.msra.gmra.mxu1 %vm327_vm0, %v230_v48  ;;  %722 = vmatmul.msk.bf16.vlgmr.msra.gmra.mxu2 %vm327_vm0, %v230_v48 }
  0x24   : > { %723 = vmatmul.msk.bf16.vlgmr.msra.gmra.mxu3 %vm327_vm0, %v230_v48 }
  0x9f   : > { %v340_v49 = vpop.f32.mrf.mxu0 }
  0xa0   : > { %v353_v50 = vpop.f32.mrf.mxu1 }
  0xa1   : > { %v386_v51 = vpack.c.bf16 %v353_v50, %v340_v49  ;;  %v394_v52 = vadd.f32 %v353_v50, %v340_v49 }
  0xa3   : > { %392 = vst [vmem:[%s391_s7] sm:$0xff] %v386_v51 }
  0xa6   : > { %v366_v53 = vpop.f32.mrf.mxu2 }
  0xa7   : > { %v379_v54 = vpop.f32.mrf.mxu3  ;;  %v342_v55 = vpop.f32.mrf.mxu0  ;;  %v395_v56 = vadd.f32 %v394_v52, %v366_v53 }
  0xa8   : > { %v387_v57 = vpack.c.bf16 %v379_v54, %v366_v53  ;;  %v355_v58 = vpop.f32.mrf.mxu1 }
  0xa9   : > { %v396_v59 = vadd.f32 %v395_v56, %v379_v54 }
  0xaa   : > { %393 = vst [vmem:[%s391_s7 + $0x8] sm:$0xff] %v387_v57 }
  0xab   : > { %397 = vadd.xlane.f32.xlu0 %v396_v59 }
  0xae   : > { %v368_v60 = vpop.f32.mrf.mxu2 }
  0xaf   : > { %v381_v61 = vpop.f32.mrf.mxu3 }
 0x11e   : > { %v398_v62 = vpop.xlane.xlu0 %397 }
 0x11f   : > { %v399_v63 = vmul.f32 0.001953125, %v398_v62 }
 0x121   : > { %v400_v0 = vsub.f32 %v340_v49, %v399_v63  ;;  %v401_v1 = vsub.f32 %v353_v50, %v399_v63  ;;  %v402_v2 = vsub.f32 %v366_v53, %v399_v63  ;;  %v403_v3 = vsub.f32 %v379_v54, %v399_v63 }
 0x123   : > { %v404_v4 = vmul.f32 %v400_v0, %v400_v0  ;;  %v405_v5 = vmul.f32 %v401_v1, %v401_v1  ;;  %v406_v6 = vmul.f32 %v402_v2, %v402_v2  ;;  %v407_v8 = vmul.f32 %v403_v3, %v403_v3 }
 0x125   : > { %v408_v7 = vadd.f32 %v405_v5, %v404_v4 }
 0x127   : > { %v409_v9 = vadd.f32 %v408_v7, %v406_v6 }
 0x129   : > { %v410_v10 = vadd.f32 %v409_v9, %v407_v8 }
 0x12b   : > { %411 = vadd.xlane.f32.xlu0 %v410_v10 }
 0x19a   : > { %416 = sbr.rel (%p726_p5) target bundleno = 418 (0x1a2), region = 40 }
 0x19e   : > { %v412_v11 = vpop.xlane.xlu0 %411 }
 0x19f   : > { %vm417_vm1 = vcmask 7168   ;;  %v805_v12 = vmov 0.0  }
 0x1a0   : > { %418 = vst.msk [vmem:[#allocation2] sm:$0xff] %vm417_vm1, %v805_v12 }
 0x1a1   : > { %419 = vst.msk [vmem:[#allocation3] sm:$0xff] %vm417_vm1, %v805_v12 }
 0x1a2 PF: > { %s421_s8 = scvt.s32.f32 %s724_s28  ;;  %vm445_vm6 = vcmask 7168   ;;  %p728_p6 = scmp.ne.s32.totalorder %s795_s15, 3 }
 0x1a4   : > { %s422_s9 = sadd.f32 512.0, %s421_s8  ;;  %s450_s10 = smul.f32 512.0, %s421_s8 }
 0x1a6   : > { %v425_v13 = vstv %s422_s9 }
 0x1a7   : > { %776 = vrcp.f32 %v425_v13  ;;  %v437_v16 = vand.u32 2147483648, %v425_v13  ;;  %vm431_vm2 = vweird.f32 %v425_v13  ;;  %v435_v18 = vand.u32 2147483647, %v425_v13  ;;  %v423_v24 = vld [vmem:[#allocation2] sm:$0xff] }
 0x1a8   : > { %v424_v25 = vsub.f32 %v399_v63, %v423_v24  ;;  %v447_v26 = vld [vmem:[#allocation3] sm:$0xff] }
 0x1a9   : > { %v438_v20 = vor.u32 1.1754944e-38, %v437_v16  ;;  %vm436_vm5 = vcmp.eq.f32.partialorder %v435_v18, 8.507059e+37  ;;  %v448_v29 = vadd.f32 %v447_v26, %v412_v11 }
 0x1aa   : > { %v449_v27 = vmul.f32 %v424_v25, %v424_v25 }
 0x1ad   : > { %v777_v14 = vpop.eup %776 }
 0x1ae   : > { %v427_v15 = vmul.f32 %v777_v14, %v425_v13  ;;  %vm432_vm3 = vweird.f32 %v777_v14 }
 0x1af   : > { %vm433_vm4 = vmor %vm431_vm2, %vm432_vm3 }
 0x1b0   : > { %v428_v17 = vsub.f32 1.0, %v427_v15 }
 0x1b2   : > { %v429_v19 = vmul.f32 %v777_v14, %v428_v17 }
 0x1b4   : > { %v430_v21 = vadd.f32 %v777_v14, %v429_v19 }
 0x1b6   : > { %v434_v22 = vsel %vm433_vm4, %v777_v14, %v430_v21 }
 0x1b7   : > { %v439_v23 = vsel %vm436_vm5, %v438_v20, %v434_v22 }
 0x1b8   : > { %748 = vpush %v439_v23 }
 0x1e9   : > { %s749_s11 = spop %748 }
 0x1ea   : > { %s441_s12 = smul.f32 512.0, %s749_s11 }
 0x1eb   : > { %s467_s13 = smul.f32 %s749_s11, %s450_s10 }
 0x1ec   : > { %v442_v28 = vstv %s441_s12 }
 0x1ed   : > { %v443_v30 = vmul.f32 %v442_v28, %v424_v25  ;;  %v468_v31 = vstv %s467_s13 }
 0x1ee   : > { %v469_v32 = vmul.f32 %v468_v31, %v449_v27  ;;  %475 = sbr.rel (%p728_p6) target bundleno = 670 (0x29e), region = 44 }
 0x1ef   : > { %v444_v33 = vadd.f32 %v443_v30, %v423_v24 }
 0x1f0   : > { %v470_v34 = vadd.f32 %v469_v32, %v448_v29 }
 0x1f1   : > { %446 = vst.msk [vmem:[#allocation2] sm:$0xff] %vm445_vm6, %v444_v33 }
 0x1f2   : > { %471 = vst.msk [vmem:[#allocation3] sm:$0xff] %vm445_vm6, %v470_v34 }
 0x1f3   : > { %v806_v36 = vmov 0   ;;  %v479_v44 = vld [vmem:[%s975_s2] sm:$0xff]  ;;  %v496_v53 = vld [vmem:[%s977_s4 + $0x8] sm:$0xff]  ;;  %v497_v54 = vld [vmem:[%s977_s4 + $0x10] sm:$0xff] }
 0x1f4   : > { %778 = vset.pattern.permute.xlu0 %v806_v36  ;;  %v492_v50 = vld [vmem:[%s976_s3] sm:$0xff]  ;;  %v498_v55 = vld [vmem:[%s977_s4 + $0x18] sm:$0xff]  ;;  %v500_v58 = vld [vmem:[%s977_s4 + $0x28] sm:$0xff]  ;;  %v505_v63 = vunpack.c.l.bf16 %v496_v53  ;;  %v506_v0 = vunpack.c.h.bf16 %v496_v53  ;;  %v507_v1 = vunpack.c.l.bf16 %v497_v54  ;;  %v508_v2 = vunpack.c.h.bf16 %v497_v54 }
 0x1f5   : > { %v495_v52 = vld [vmem:[%s977_s4] sm:$0xff]  ;;  %v501_v59 = vld [vmem:[%s977_s4 + $0x30] sm:$0xff]  ;;  %v502_v60 = vld [vmem:[%s977_s4 + $0x38] sm:$0xff]  ;;  %v509_v3 = vunpack.c.l.bf16 %v498_v55  ;;  %v510_v4 = vunpack.c.h.bf16 %v498_v55  ;;  %v513_v7 = vunpack.c.l.bf16 %v500_v58  ;;  %v514_v8 = vunpack.c.h.bf16 %v500_v58 }
 0x1f6   : > { %v499_v57 = vld [vmem:[%s977_s4 + $0x20] sm:$0xff]  ;;  %v503_v61 = vunpack.c.l.bf16 %v495_v52  ;;  %v504_v62 = vunpack.c.h.bf16 %v495_v52  ;;  %v515_v9 = vunpack.c.l.bf16 %v501_v59  ;;  %v516_v10 = vunpack.c.h.bf16 %v501_v59 }
 0x1f7   : > { %v511_v5 = vunpack.c.l.bf16 %v499_v57  ;;  %v512_v6 = vunpack.c.h.bf16 %v499_v57  ;;  %v517_v11 = vunpack.c.l.bf16 %v502_v60  ;;  %v518_v12 = vunpack.c.h.bf16 %v502_v60 }
 0x1f8   : > { %v476_v47 = vld [vmem:[#allocation2] sm:$0xff] }
 0x1f9   : > { %v477_v35 = vld [vmem:[#allocation3] sm:$0xff] }
 0x1fa   : > { %v478_v37 = vmul.f32 0.00048828125, %v477_v35 }
 0x1fc   : > { %v480_v38 = vadd.f32 1e-05, %v478_v37 }
 0x1fe   : > { %779 = vrsqrt.f32 %v480_v38  ;;  %vm487_vm7 = vweird.f32 %v480_v38 }
 0x204   : > { %v780_v39 = vpop.eup %779 }
 0x205   : > { %v482_v40 = vmul.f32 %v780_v39, %v480_v38  ;;  %vm488_vm8 = vweird.f32 %v780_v39 }
 0x206   : > { %vm489_vm9 = vmor %vm487_vm7, %vm488_vm8 }
 0x207   : > { %v483_v41 = vmul.f32 %v780_v39, %v482_v40 }
 0x209   : > { %v484_v42 = vmul.f32 0.5, %v483_v41 }
 0x20b   : > { %v485_v43 = vsub.f32 1.5, %v484_v42 }
 0x20d   : > { %v486_v45 = vmul.f32 %v780_v39, %v485_v43 }
 0x20f   : > { %v490_v46 = vsel %vm489_vm9, %v780_v39, %v486_v45 }
 0x210   : > { %v491_v48 = vmul.f32 %v490_v46, %v479_v44 }
 0x212   : > { %521 = vperm.xlu0 %778, %v491_v48   ;;  %v493_v49 = vmul.f32 %v491_v48, %v476_v47 }
 0x214   : > { %v494_v51 = vsub.f32 %v492_v50, %v493_v49 }
 0x21a   : > { %542 = vperm.xlu0 %778, %v494_v51  }
 0x284   : > { %v522_v56 = vpop.permute.xlu0 %521 }
 0x285   : > { %v524_v13 = vmul.f32 %v522_v56, %v503_v61  ;;  %v525_v14 = vmul.f32 %v522_v56, %v504_v62  ;;  %v526_v15 = vmul.f32 %v522_v56, %v505_v63  ;;  %v527_v16 = vmul.f32 %v522_v56, %v506_v0 }
 0x286   : > { %v528_v17 = vmul.f32 %v522_v56, %v507_v1  ;;  %v529_v18 = vmul.f32 %v522_v56, %v508_v2  ;;  %v530_v19 = vmul.f32 %v522_v56, %v509_v3  ;;  %v531_v20 = vmul.f32 %v522_v56, %v510_v4 }
 0x287   : > { %v532_v21 = vmul.f32 %v522_v56, %v511_v5  ;;  %v533_v22 = vmul.f32 %v522_v56, %v512_v6  ;;  %v534_v23 = vmul.f32 %v522_v56, %v513_v7  ;;  %v535_v24 = vmul.f32 %v522_v56, %v514_v8 }
 0x288   : > { %v536_v25 = vmul.f32 %v522_v56, %v515_v9  ;;  %v537_v26 = vmul.f32 %v522_v56, %v516_v10  ;;  %v538_v27 = vmul.f32 %v522_v56, %v517_v11  ;;  %v539_v28 = vmul.f32 %v522_v56, %v518_v12 }
 0x28c   : > { %v543_v29 = vpop.permute.xlu0 %542 }
 0x28d   : > { %v545_v30 = vadd.f32 %v543_v29, %v524_v13  ;;  %v546_v31 = vadd.f32 %v543_v29, %v525_v14  ;;  %v547_v32 = vadd.f32 %v543_v29, %v526_v15  ;;  %v548_v33 = vadd.f32 %v543_v29, %v527_v16 }
 0x28e   : > { %v549_v34 = vadd.f32 %v543_v29, %v528_v17  ;;  %v550_v35 = vadd.f32 %v543_v29, %v529_v18  ;;  %v551_v36 = vadd.f32 %v543_v29, %v530_v19  ;;  %v552_v37 = vadd.f32 %v543_v29, %v531_v20 }
 0x28f   : > { %v553_v38 = vadd.f32 %v543_v29, %v532_v21  ;;  %v554_v39 = vadd.f32 %v543_v29, %v533_v22  ;;  %v555_v40 = vadd.f32 %v543_v29, %v534_v23  ;;  %v556_v41 = vadd.f32 %v543_v29, %v535_v24 }
 0x290   : > { %v557_v42 = vadd.f32 %v543_v29, %v536_v25  ;;  %v558_v43 = vadd.f32 %v543_v29, %v537_v26  ;;  %v559_v44 = vadd.f32 %v543_v29, %v538_v27  ;;  %v560_v45 = vadd.f32 %v543_v29, %v539_v28 }
 0x291   : > { %v561_v46 = vmax.f32 %v545_v30, 0.0  ;;  %v562_v47 = vmax.f32 %v546_v31, 0.0  ;;  %v563_v48 = vmax.f32 %v547_v32, 0.0  ;;  %v564_v49 = vmax.f32 %v548_v33, 0.0 }
 0x292   : > { %v565_v50 = vmax.f32 %v549_v34, 0.0  ;;  %v566_v51 = vmax.f32 %v550_v35, 0.0  ;;  %v567_v52 = vmax.f32 %v551_v36, 0.0  ;;  %v568_v53 = vmax.f32 %v552_v37, 0.0 }
 0x293   : > { %v569_v54 = vmax.f32 %v553_v38, 0.0  ;;  %v570_v55 = vmax.f32 %v554_v39, 0.0  ;;  %v571_v56 = vmax.f32 %v555_v40, 0.0  ;;  %v572_v57 = vmax.f32 %v556_v41, 0.0 }
 0x294   : > { %v573_v58 = vmax.f32 %v557_v42, 0.0  ;;  %v574_v59 = vmax.f32 %v558_v43, 0.0  ;;  %v577_v60 = vpack.c.bf16 %v562_v47, %v561_v46  ;;  %v578_v61 = vpack.c.bf16 %v564_v49, %v563_v48 }
 0x295   : > { %v579_v62 = vpack.c.bf16 %v566_v51, %v565_v50  ;;  %v575_v63 = vmax.f32 %v559_v44, 0.0  ;;  %v576_v0 = vmax.f32 %v560_v45, 0.0  ;;  %v580_v1 = vpack.c.bf16 %v568_v53, %v567_v52 }
 0x296   : > { %v581_v2 = vpack.c.bf16 %v570_v55, %v569_v54  ;;  %585 = vst [vmem:[%s977_s4] sm:$0xff] %v577_v60  ;;  %v582_v3 = vpack.c.bf16 %v572_v57, %v571_v56  ;;  %v583_v4 = vpack.c.bf16 %v574_v59, %v573_v58 }
 0x297   : > { %586 = vst [vmem:[%s977_s4 + $0x8] sm:$0xff] %v578_v61  ;;  %v584_v5 = vpack.c.bf16 %v576_v0, %v575_v63 }
 0x298   : > { %587 = vst [vmem:[%s977_s4 + $0x10] sm:$0xff] %v579_v62 }
 0x299   : > { %588 = vst [vmem:[%s977_s4 + $0x18] sm:$0xff] %v580_v1 }
 0x29a   : > { %589 = vst [vmem:[%s977_s4 + $0x20] sm:$0xff] %v581_v2 }
 0x29b   : > { %590 = vst [vmem:[%s977_s4 + $0x28] sm:$0xff] %v582_v3 }
 0x29c   : > { %591 = vst [vmem:[%s977_s4 + $0x30] sm:$0xff] %v583_v4 }
 0x29d   : > { %592 = vst [vmem:[%s977_s4 + $0x38] sm:$0xff] %v584_v5 }
 0x29e PF: > { %s14_s17 = sadd.s32 1, %s803_s17   ;;  %s978_s15 = smov %s799_s16 }
 0x29f   : > { %p11_p7 = scmp.ge.s32.totalorder %s14_s17, 6   ;;  %s979_s16 = smov %s981_s18 }
 0x2a1   :  { %13 = sbr.rel (!%p11_p7) target bundleno = 2 (0x2), region = 74 }

// kernel: generator_forward.3
= control target key start
LH: loop header
LB: loop body
LE: loop exit
PB: predicated region body
PF: predicated region fallthrough
CT: control target
= control target key end

     0   :  { %s1036_s9 = smov 0   ;;  %s1038_s10 = smov 0   ;;  %s1195_s0 = inlined_call_operand.vmem [shape: bf16[4,3,32], index: 0, kind: input, shape index: {}]   ;;  %s1196_s1 = inlined_call_operand.vmem [shape: bf16[4,32,2048], index: 1, kind: input, shape index: {}]   ;;  %s1197_s2 = inlined_call_operand.vmem [shape: f32[3,8192], index: 2, kind: output, shape index: {}]  }
   0x1   :  { %s1040_s11 = smov 0  }
   0x2 LB: > { %s24_s12 = sadd.s32 1, %s1015_s10  ;;  %p756_p0 = scmp.ge.s32.totalorder %s1019_s11, 1  ;;  %s1019_s11 = sphi %s1040_s11, %s12_s11   ;;  %s1015_s10 = sphi %s1038_s10, %s1199_s10   ;;  %s1011_s9 = sphi %s1036_s9, %s1198_s9  }
   0x3   : > { %p26_p1 = scmp.ge.s32.totalorder %s24_s12, 4  ;;  %p142_p2 = scmp.lt.s32.totalorder %s1019_s11, 5 }
   0x5   : > { %s1201_s12 = smov (%p26_p1, %s24_s12), 0  ;;  %p143_p3 = pnand %p756_p0, %p142_p2 }
   0x6   : > { %p173_p4 = scmp.lt.s32.totalorder (!%p143_p3), %s1011_s9, 3  ;;  %s760_s22 = sshll.u32 (!%p143_p3), %s1011_s9, 4 }
   0x7   : > { %146 = sbr.rel (%p143_p3) target bundleno = 220 (0xdc), region = 28  ;;  %p189_p5 = scmp.lt.s32.totalorder (!%p143_p3), %s760_s22, 63 }
   0xc   : > { %s174_s13 = scalar_select %p173_p4, %s1011_s9, 3  ;;  %vm389_vm0 = vcmask 261120   ;;  %vm641_vm1 = vcmask 1043456  }
   0xd   : > { %s1203_s22 = smov (!%p189_p5, %s760_s22), 63 }
   0xe   : > { %s908_s14 = sshll.u32 %s174_s13, 8  ;;  %s757_s18 = sshll.u32 %s174_s13, 1 }
   0xf   : > { %s1061_s17 = scalar_lea.vmem %s1196_s1, %s908_s14  ;;  %s176_s21 = scalar_lea.vmem %s1195_s0, %s757_s18 }
  0x10   : > { %v828_v0 = vld [vmem:[%s1061_s17 + $0x80] sm:$0xf]  ;;  %v925_v2 = vld [vmem:[%s1061_s17 + $0x84] sm:$0xf]  ;;  %v836_v5 = vld [vmem:[%s1061_s17 + $0x88] sm:$0xf] }
  0x11   : > { %v933_v1 = vld [vmem:[%s1061_s17 + $0xbc] sm:$0xf0]  ;;  %v830_v4 = vld [vmem:[%s1061_s17 + $0xc0] sm:$0xf0]  ;;  %v934_v6 = vld [vmem:[%s1061_s17 + $0xc4] sm:$0xf0] }
  0x12   : > { %v829_v3 = vor.u32 %v933_v1, %v828_v0  ;;  %v833_v7 = vor.u32 %v925_v2, %v830_v4  ;;  %v837_v8 = vor.u32 %v934_v6, %v836_v5  ;;  %v926_v9 = vld [vmem:[%s1061_s17 + $0x8c] sm:$0xf]  ;;  %v764_v11 = vld [vmem:[%s1061_s17] sm:$0xf]  ;;  %v909_v14 = vld [vmem:[%s1061_s17 + $0x4] sm:$0xf] }
  0x13   : > { %v838_v10 = vld [vmem:[%s1061_s17 + $0xc8] sm:$0xf0]  ;;  %v917_v13 = vld [vmem:[%s1061_s17 + $0x3c] sm:$0xf0]  ;;  %v766_v15 = vld [vmem:[%s1061_s17 + $0x40] sm:$0xf0] }
  0x14   : > { %399 = vmatpush.bf16.msra.mxu0 %v829_v3  ;;  %v841_v12 = vor.u32 %v926_v9, %v838_v10  ;;  %412 = vmatpush.bf16.msra.mxu1 %v833_v7  ;;  %v765_v16 = vor.u32 %v917_v13, %v764_v11  ;;  %v769_v17 = vor.u32 %v909_v14, %v766_v15  ;;  %v772_v18 = vld [vmem:[%s1061_s17 + $0x8] sm:$0xf]  ;;  %v910_v20 = vld [vmem:[%s1061_s17 + $0xc] sm:$0xf]  ;;  %v1082_v23 = vld [vmem:[%s176_s21] sm:$0x3] }
  0x15   : > { %425 = vmatpush.bf16.msra.mxu2 %v837_v8  ;;  %v918_v19 = vld [vmem:[%s1061_s17 + $0x44] sm:$0xf0]  ;;  %v774_v22 = vld [vmem:[%s1061_s17 + $0x48] sm:$0xf0]  ;;  %v928_v24 = vld [vmem:[%s1061_s17 + $0x9c] sm:$0xf] }
  0x16   : > { %438 = vmatpush.bf16.msra.mxu3 %v841_v12  ;;  %v773_v21 = vor.u32 %v918_v19, %v772_v18  ;;  %v777_v25 = vor.u32 %v910_v20, %v774_v22  ;;  %v854_v26 = vld [vmem:[%s1061_s17 + $0xd8] sm:$0xf0]  ;;  %v852_v27 = vld [vmem:[%s1061_s17 + $0x98] sm:$0xf]  ;;  %v927_v31 = vld [vmem:[%s1061_s17 + $0x94] sm:$0xf] }
  0x17   : > { %v936_v28 = vld [vmem:[%s1061_s17 + $0xd4] sm:$0xf0]  ;;  %v857_v29 = vor.u32 %v928_v24, %v854_v26  ;;  %v846_v32 = vld [vmem:[%s1061_s17 + $0xd0] sm:$0xf0]  ;;  %v844_v33 = vld [vmem:[%s1061_s17 + $0x90] sm:$0xf] }
  0x18   : > { %400 = vmatpush.bf16.msra.mxu0 %v765_v16  ;;  %v853_v30 = vor.u32 %v936_v28, %v852_v27  ;;  %413 = vmatpush.bf16.msra.mxu1 %v769_v17  ;;  %v849_v34 = vor.u32 %v927_v31, %v846_v32  ;;  %v935_v35 = vld [vmem:[%s1061_s17 + $0xcc] sm:$0xf0]  ;;  %v912_v36 = vld [vmem:[%s1061_s17 + $0x1c] sm:$0xf]  ;;  %v788_v39 = vld [vmem:[%s1061_s17 + $0x18] sm:$0xf] }
  0x19   : > { %426 = vmatpush.bf16.msra.mxu2 %v773_v21  ;;  %v790_v37 = vld [vmem:[%s1061_s17 + $0x58] sm:$0xf0]  ;;  %v845_v38 = vor.u32 %v935_v35, %v844_v33  ;;  %v920_v40 = vld [vmem:[%s1061_s17 + $0x54] sm:$0xf0]  ;;  %v780_v41 = vld [vmem:[%s1061_s17 + $0x10] sm:$0xf] }
  0x1a   : > { %439 = vmatpush.bf16.msra.mxu3 %v777_v25  ;;  %v793_v42 = vor.u32 %v912_v36, %v790_v37  ;;  %v789_v43 = vor.u32 %v920_v40, %v788_v39  ;;  %v919_v44 = vld [vmem:[%s1061_s17 + $0x4c] sm:$0xf0]  ;;  %v911_v45 = vld [vmem:[%s1061_s17 + $0x14] sm:$0xf]  ;;  %v930_v47 = vld [vmem:[%s1061_s17 + $0xac] sm:$0xf] }
  0x1b   : > { %890 = vmatmul.msk.bf16.vlgmr.msra.gmra.mxu0 %vm389_vm0, %v1082_v23  ;;  %v782_v46 = vld [vmem:[%s1061_s17 + $0x50] sm:$0xf0]  ;;  %891 = vmatmul.msk.bf16.vlgmr.msra.gmra.mxu1 %vm389_vm0, %v1082_v23  ;;  %v870_v48 = vld [vmem:[%s1061_s17 + $0xe8] sm:$0xf0]  ;;  %v868_v49 = vld [vmem:[%s1061_s17 + $0xa8] sm:$0xf]  ;;  %v781_v55 = vor.u32 %v919_v44, %v780_v41 }
  0x1c   : > { %892 = vmatmul.msk.bf16.vlgmr.msra.gmra.mxu2 %vm389_vm0, %v1082_v23  ;;  %464 = vmatpush.bf16.msrb.mxu1 %v849_v34  ;;  %v785_v50 = vor.u32 %v911_v45, %v782_v46  ;;  %v873_v51 = vor.u32 %v930_v47, %v870_v48  ;;  %v938_v52 = vld [vmem:[%s1061_s17 + $0xe4] sm:$0xf0]  ;;  %v929_v53 = vld [vmem:[%s1061_s17 + $0xa4] sm:$0xf]  ;;  %v860_v58 = vld [vmem:[%s1061_s17 + $0xa0] sm:$0xf] }
  0x1d   : > { %477 = vmatpush.bf16.msrb.mxu2 %v853_v30  ;;  %893 = vmatmul.msk.bf16.vlgmr.msra.gmra.mxu3 %vm389_vm0, %v1082_v23  ;;  %v862_v54 = vld [vmem:[%s1061_s17 + $0xe0] sm:$0xf0]  ;;  %v869_v56 = vor.u32 %v938_v52, %v868_v49  ;;  %v937_v59 = vld [vmem:[%s1061_s17 + $0xdc] sm:$0xf0]  ;;  %v914_v60 = vld [vmem:[%s1061_s17 + $0x2c] sm:$0xf] }
  0x1e   : > { %490 = vmatpush.bf16.msrb.mxu3 %v857_v29  ;;  %451 = vmatpush.bf16.msrb.mxu0 %v845_v38  ;;  %v865_v57 = vor.u32 %v929_v53, %v862_v54  ;;  %v861_v61 = vor.u32 %v937_v59, %v860_v58  ;;  %v806_v62 = vld [vmem:[%s1061_s17 + $0x68] sm:$0xf0]  ;;  %v804_v63 = vld [vmem:[%s1061_s17 + $0x28] sm:$0xf]  ;;  %v796_v3 = vld [vmem:[%s1061_s17 + $0x20] sm:$0xf] }
  0x1f   : > { %v922_v0 = vld [vmem:[%s1061_s17 + $0x64] sm:$0xf0]  ;;  %v809_v1 = vor.u32 %v914_v60, %v806_v62  ;;  %v921_v4 = vld [vmem:[%s1061_s17 + $0x5c] sm:$0xf0]  ;;  %v913_v5 = vld [vmem:[%s1061_s17 + $0x24] sm:$0xf] }
  0x20   : > { %v805_v2 = vor.u32 %v922_v0, %v804_v63  ;;  %465 = vmatpush.bf16.msrb.mxu1 %v785_v50  ;;  %v798_v6 = vld [vmem:[%s1061_s17 + $0x60] sm:$0xf0]  ;;  %v797_v8 = vor.u32 %v921_v4, %v796_v3  ;;  %v932_v9 = vld [vmem:[%s1061_s17 + $0xbc] sm:$0xf]  ;;  %v884_v10 = vld [vmem:[%s1061_s17 + $0xb8] sm:$0xf] }
  0x21   : > { %478 = vmatpush.bf16.msrb.mxu2 %v789_v43  ;;  %v801_v7 = vor.u32 %v913_v5, %v798_v6  ;;  %v940_v11 = vld [vmem:[%s1061_s17 + $0xf4] sm:$0xf0]  ;;  %v886_v12 = vld [vmem:[%s1061_s17 + $0xf8] sm:$0xf0]  ;;  %v931_v13 = vld [vmem:[%s1061_s17 + $0xb4] sm:$0xf] }
  0x22   : > { %491 = vmatpush.bf16.msrb.mxu3 %v793_v42  ;;  %452 = vmatpush.bf16.msrb.mxu0 %v781_v55  ;;  %v878_v14 = vld [vmem:[%s1061_s17 + $0xf0] sm:$0xf0]  ;;  %v876_v15 = vld [vmem:[%s1061_s17 + $0xb0] sm:$0xf]  ;;  %v885_v17 = vor.u32 %v940_v11, %v884_v10  ;;  %v889_v18 = vor.u32 %v932_v9, %v886_v12  ;;  %v916_v20 = vld [vmem:[%s1061_s17 + $0x3c] sm:$0xf] }
  0x23   : > { %v939_v16 = vld [vmem:[%s1061_s17 + $0xec] sm:$0xf0]  ;;  %v881_v19 = vor.u32 %v931_v13, %v878_v14  ;;  %v820_v21 = vld [vmem:[%s1061_s17 + $0x38] sm:$0xf]  ;;  %v822_v25 = vld [vmem:[%s1061_s17 + $0x78] sm:$0xf0] }
  0x24   : > { %516 = vmatpush.bf16.msra.mxu1 %v865_v57  ;;  %v924_v22 = vld [vmem:[%s1061_s17 + $0x74] sm:$0xf0]  ;;  %v877_v24 = vor.u32 %v939_v16, %v876_v15  ;;  %v915_v26 = vld [vmem:[%s1061_s17 + $0x34] sm:$0xf]  ;;  %v812_v28 = vld [vmem:[%s1061_s17 + $0x30] sm:$0xf]  ;;  %v825_v31 = vor.u32 %v916_v20, %v822_v25 }
  0x25   : > { %529 = vmatpush.bf16.msra.mxu2 %v869_v56  ;;  %v814_v27 = vld [vmem:[%s1061_s17 + $0x70] sm:$0xf0]  ;;  %v923_v29 = vld [vmem:[%s1061_s17 + $0x6c] sm:$0xf0]  ;;  %v821_v30 = vor.u32 %v924_v22, %v820_v21  ;;  %s761_s23 = sshll.u32 %s1203_s22, 2 }
  0x26   : > { %542 = vmatpush.bf16.msra.mxu3 %v873_v51  ;;  %503 = vmatpush.bf16.msra.mxu0 %v861_v61  ;;  %v817_v32 = vor.u32 %v915_v26, %v814_v27  ;;  %v813_v33 = vor.u32 %v923_v29, %v812_v28  ;;  %s1168_s26 = scalar_lea.vmem %s1197_s2, %s761_s23 }
  0x28   : > { %517 = vmatpush.bf16.msra.mxu1 %v801_v7 }
  0x29   : > { %530 = vmatpush.bf16.msra.mxu2 %v805_v2 }
  0x2a   : > { %543 = vmatpush.bf16.msra.mxu3 %v809_v1  ;;  %504 = vmatpush.bf16.msra.mxu0 %v797_v8 }
  0x2b   : > { %894 = vmatmul.msk.bf16.vlgmr.msrb.gmra.mxu0 %vm389_vm0, %v1082_v23  ;;  %895 = vmatmul.msk.bf16.vlgmr.msrb.gmra.mxu1 %vm389_vm0, %v1082_v23 }
  0x2c   : > { %896 = vmatmul.msk.bf16.vlgmr.msrb.gmra.mxu2 %vm389_vm0, %v1082_v23  ;;  %568 = vmatpush.bf16.msrb.mxu1 %v881_v19 }
  0x2d   : > { %897 = vmatmul.msk.bf16.vlgmr.msrb.gmra.mxu3 %vm389_vm0, %v1082_v23  ;;  %581 = vmatpush.bf16.msrb.mxu2 %v885_v17 }
  0x2e   : > { %594 = vmatpush.bf16.msrb.mxu3 %v889_v18  ;;  %555 = vmatpush.bf16.msrb.mxu0 %v877_v24 }
  0x30   : > { %569 = vmatpush.bf16.msrb.mxu1 %v817_v32 }
  0x31   : > { %582 = vmatpush.bf16.msrb.mxu2 %v821_v30 }
  0x32   : > { %595 = vmatpush.bf16.msrb.mxu3 %v825_v31  ;;  %556 = vmatpush.bf16.msrb.mxu0 %v813_v33 }
  0x3b   : > { %898 = vmatmul.msk.bf16.vlgmr.msra.gmra.mxu0 %vm389_vm0, %v1082_v23  ;;  %899 = vmatmul.msk.bf16.vlgmr.msra.gmra.mxu1 %vm389_vm0, %v1082_v23 }
  0x3c   : > { %900 = vmatmul.msk.bf16.vlgmr.msra.gmra.mxu2 %vm389_vm0, %v1082_v23 }
  0x3d   : > { %901 = vmatmul.msk.bf16.vlgmr.msra.gmra.mxu3 %vm389_vm0, %v1082_v23 }
  0x4b   : > { %902 = vmatmul.msk.bf16.vlgmr.msrb.gmra.mxu0 %vm389_vm0, %v1082_v23  ;;  %903 = vmatmul.msk.bf16.vlgmr.msrb.gmra.mxu1 %vm389_vm0, %v1082_v23 }
  0x4c   : > { %904 = vmatmul.msk.bf16.vlgmr.msrb.gmra.mxu2 %vm389_vm0, %v1082_v23 }
  0x4d   : > { %905 = vmatmul.msk.bf16.vlgmr.msrb.gmra.mxu3 %vm389_vm0, %v1082_v23 }
  0x98   : > { %v402_v34 = vpop.f32.mrf.mxu0  ;;  %v415_v35 = vpop.f32.mrf.mxu1 }
  0x99   : > { %965 = vtanh.f32 %v402_v34 }
  0x9a   : > { %967 = vtanh.f32 %v415_v35 }
  0x9f   : > { %v966_v36 = vpop.eup %965  ;;  %v428_v37 = vpop.f32.mrf.mxu2 }
  0xa0   : > { %v968_v38 = vpop.eup %967  ;;  %969 = vtanh.f32 %v428_v37  ;;  %v441_v39 = vpop.f32.mrf.mxu3 }
  0xa1   : > { %v404_v40 = vpop.f32.mrf.mxu0  ;;  %v633_v23 = vrot.slane %v968_v38, 4  ;;  %971 = vtanh.f32 %v441_v39  ;;  %v417_v41 = vpop.f32.mrf.mxu1 }
  0xa3   : > { %v642_v42 = vsel %vm641_vm1, %v966_v36, %v633_v23 }
  0xa4   : > { %658 = vst [vmem:[%s1168_s26] sm:$0x77] %v642_v42 }
  0xa6   : > { %v970_v43 = vpop.eup %969 }
  0xa7   : > { %v972_v44 = vpop.eup %971  ;;  %v430_v45 = vpop.f32.mrf.mxu2 }
  0xa8   : > { %v634_v46 = vrot.slane %v972_v44, 4  ;;  %v443_v47 = vpop.f32.mrf.mxu3 }
  0xa9   : > { %v454_v48 = vpop.f32.mrf.mxu0  ;;  %v467_v49 = vpop.f32.mrf.mxu1 }
  0xaa   : > { %973 = vtanh.f32 %v454_v48  ;;  %v643_v50 = vsel %vm641_vm1, %v970_v43, %v634_v46 }
  0xab   : > { %975 = vtanh.f32 %v467_v49  ;;  %659 = vst [vmem:[%s1168_s26 + $0x8] sm:$0x77] %v643_v50 }
  0xaf   : > { %v480_v52 = vpop.f32.mrf.mxu2 }
  0xb0   : > { %v974_v51 = vpop.eup %973  ;;  %977 = vtanh.f32 %v480_v52  ;;  %v493_v54 = vpop.f32.mrf.mxu3 }
  0xb1   : > { %v976_v53 = vpop.eup %975  ;;  %v456_v55 = vpop.f32.mrf.mxu0  ;;  %979 = vtanh.f32 %v493_v54 }
  0xb2   : > { %v635_v56 = vrot.slane %v976_v53, 4  ;;  %v469_v57 = vpop.f32.mrf.mxu1 }
  0xb4   : > { %v644_v58 = vsel %vm641_vm1, %v974_v51, %v635_v56 }
  0xb5   : > { %660 = vst [vmem:[%s1168_s26 + $0x10] sm:$0x77] %v644_v58 }
  0xb6   : > { %v978_v59 = vpop.eup %977 }
  0xb7   : > { %v980_v60 = vpop.eup %979  ;;  %v482_v61 = vpop.f32.mrf.mxu2 }
  0xb8   : > { %v636_v62 = vrot.slane %v980_v60, 4  ;;  %v495_v63 = vpop.f32.mrf.mxu3 }
  0xb9   : > { %v506_v0 = vpop.f32.mrf.mxu0 }
  0xba   : > { %981 = vtanh.f32 %v506_v0  ;;  %v519_v1 = vpop.f32.mrf.mxu1  ;;  %v645_v2 = vsel %vm641_vm1, %v978_v59, %v636_v62 }
  0xbb   : > { %983 = vtanh.f32 %v519_v1  ;;  %661 = vst [vmem:[%s1168_s26 + $0x18] sm:$0x77] %v645_v2 }
  0xbf   : > { %v532_v4 = vpop.f32.mrf.mxu2 }
  0xc0   : > { %v982_v3 = vpop.eup %981  ;;  %985 = vtanh.f32 %v532_v4  ;;  %v545_v6 = vpop.f32.mrf.mxu3 }
  0xc1   : > { %v984_v5 = vpop.eup %983  ;;  %v508_v7 = vpop.f32.mrf.mxu0  ;;  %987 = vtanh.f32 %v545_v6 }
  0xc2   : > { %v637_v8 = vrot.slane %v984_v5, 4  ;;  %v521_v9 = vpop.f32.mrf.mxu1 }
  0xc4   : > { %v646_v10 = vsel %vm641_vm1, %v982_v3, %v637_v8 }
  0xc5   : > { %662 = vst [vmem:[%s1168_s26 + $0x20] sm:$0x77] %v646_v10 }
  0xc6   : > { %v986_v11 = vpop.eup %985 }
  0xc7   : > { %v988_v12 = vpop.eup %987  ;;  %v534_v13 = vpop.f32.mrf.mxu2 }
  0xc8   : > { %v638_v14 = vrot.slane %v988_v12, 4  ;;  %v547_v15 = vpop.f32.mrf.mxu3 }
  0xc9   : > { %v558_v16 = vpop.f32.mrf.mxu0 }
  0xca   : > { %989 = vtanh.f32 %v558_v16  ;;  %v571_v17 = vpop.f32.mrf.mxu1  ;;  %v647_v18 = vsel %vm641_vm1, %v986_v11, %v638_v14 }
  0xcb   : > { %991 = vtanh.f32 %v571_v17  ;;  %663 = vst [vmem:[%s1168_s26 + $0x28] sm:$0x77] %v647_v18 }
  0xcf   : > { %v584_v20 = vpop.f32.mrf.mxu2 }
  0xd0   : > { %v990_v19 = vpop.eup %989  ;;  %993 = vtanh.f32 %v584_v20  ;;  %v597_v22 = vpop.f32.mrf.mxu3 }
  0xd1   : > { %v992_v21 = vpop.eup %991  ;;  %v560_v24 = vpop.f32.mrf.mxu0  ;;  %995 = vtanh.f32 %v597_v22 }
  0xd2   : > { %v639_v25 = vrot.slane %v992_v21, 4  ;;  %v573_v26 = vpop.f32.mrf.mxu1 }
  0xd4   : > { %v648_v27 = vsel %vm641_vm1, %v990_v19, %v639_v25 }
  0xd5   : > { %664 = vst [vmem:[%s1168_s26 + $0x30] sm:$0x77] %v648_v27 }
  0xd6   : > { %v994_v28 = vpop.eup %993 }
  0xd7   : > { %v996_v29 = vpop.eup %995  ;;  %v586_v30 = vpop.f32.mrf.mxu2 }
  0xd8   : > { %v640_v31 = vrot.slane %v996_v29, 4  ;;  %v599_v32 = vpop.f32.mrf.mxu3 }
  0xda   : > { %v649_v33 = vsel %vm641_vm1, %v994_v28, %v640_v31 }
  0xdb   : > { %665 = vst [vmem:[%s1168_s26 + $0x38] sm:$0x77] %v649_v33 }
  0xdc PF: > { %s12_s11 = sadd.s32 1, %s1019_s11   ;;  %s1198_s9 = smov %s1015_s10 }
  0xdd   : > { %p9_p6 = scmp.ge.s32.totalorder %s12_s11, 6   ;;  %s1199_s10 = smov %s1201_s12 }
  0xdf   :  { %11 = sbr.rel (!%p9_p6) target bundleno = 2 (0x2), region = 61 }

</bundles_post_ra>
